<compile_context>
chip_gen: v5e
topology: v5e:2x2
jax: 0.10.0
libtpu: 0.0.40
codegen_flags: <defaults>
</compile_context>

<pallas_src>
import jax
import jax.numpy as jnp
import numpy as np
from jax.experimental import pallas as pl
from jax.experimental.pallas import tpu as pltpu


# ---------------------------------------------------------------------------
# Fused kernel: aggregate neighbor features per step, project once at the end.
# ---------------------------------------------------------------------------
def _gat_agg_project_kernel(x_ref, m_ref, w_ref, b_ref, o_ref, acc_ref, deg_ref):
    j = pl.program_id(1)

    @pl.when(j == 0)
    def _init():
        acc_ref[...] = jnp.zeros_like(acc_ref)
        deg_ref[...] = jnp.zeros_like(deg_ref)

    mask = m_ref[...]                                       # (ti, tj) bf16, 0/1
    # Neighbor-feature aggregation on the MXU, f32 accumulation.
    acc_ref[...] += jnp.dot(mask, x_ref[...],
                            preferred_element_type=jnp.float32)
    # Per-row edge count (the bias is contributed once per aggregated edge).
    deg_ref[...] += jnp.sum(mask.astype(jnp.float32), axis=1, keepdims=True)

    @pl.when(j == pl.num_programs(1) - 1)
    def _finalize():
        # One-shot projection epilogue (f32 MXU):
        # (ti, L*Din) @ (L*Din, L*Dout) + deg[i] * tile(b, L).
        y = jnp.dot(acc_ref[...], w_ref[...],
                    preferred_element_type=jnp.float32)
        o_ref[...] = (y + deg_ref[...] * b_ref[...]).astype(o_ref.dtype)


def _round_up(x, m):
    return ((x + m - 1) // m) * m


# Multiple of 256 (v6e/v7x MXU), 128 (v5e MXU) and 16 (bf16 sublane packing).
_TILE_TARGET = 512


# ---------------------------------------------------------------------------
# Wrapper
# ---------------------------------------------------------------------------
def seq_gat_batch_forward(X, A_dense, params):
    """Pallas implementation of SeqGATBatch.forward(X_batch, A_batch).

    X:       (N, L, Din) float32
    A_dense: (N, N) float32 dense stand-in for the scipy CSR adjacency
             (entry != 0  <=>  edge (i, j); edge weights cancel out of the
             output because softmax is taken over a size-1 dimension).
    """
    N, L, Din = X.shape
    W = params["W_weight"]                      # (Dout, Din), nn.Linear layout
    b = params["W_bias"]                        # (Dout,)
    Dout = W.shape[0]
    LD_in, LD_out = L * Din, L * Dout

    # Tile sizes and padded node count (never fall back to an un-tileable N).
    if N <= _TILE_TARGET:
        n_pad = _round_up(N, 16)
        ti = tj = n_pad
    else:
        ti = tj = _TILE_TARGET
        n_pad = _round_up(N, _TILE_TARGET)

    # Block-diagonal projection weight kron(I_L, W.T) and L-tiled bias, built
    # once per call (kept f32: the projection is a once-per-row-tile epilogue).
    w_block = jnp.kron(jnp.eye(L, dtype=jnp.float32),
                       W.astype(jnp.float32).T)                    # (LDin, LDout)
    b_full = jnp.tile(b.astype(jnp.float32), L)[None, :]           # (1, LDout)

    # bf16 node features and bf16 0/1 edge indicator (halves the O(N^2) HBM
    # stream vs f32); padded rows/cols are zero so they contribute nothing.
    x_flat = jnp.zeros((n_pad, LD_in), jnp.bfloat16)
    x_flat = x_flat.at[:N].set(X.reshape(N, LD_in).astype(jnp.bfloat16))
    mask = jnp.zeros((n_pad, n_pad), jnp.bfloat16)
    mask = mask.at[:N, :N].set((A_dense != 0).astype(jnp.bfloat16))

    grid = (n_pad // ti, n_pad // tj)

    cost = pl.CostEstimate(
        flops=int(2 * n_pad * n_pad * LD_in            # aggregation matmuls
                  + 2 * n_pad * LD_in * LD_out         # one-shot projection
                  + n_pad * n_pad),                    # degree reduction
        transcendentals=0,
        bytes_accessed=int(n_pad * n_pad * 2                       # mask (bf16)
                           + grid[0] * n_pad * LD_in * 2           # X re-reads
                           + LD_in * LD_out * 4 + LD_out * 4       # W / bias
                           + n_pad * LD_out * 4),                  # output
    )

    out2 = pl.pallas_call(
        _gat_agg_project_kernel,
        out_shape=jax.ShapeDtypeStruct((n_pad, LD_out), jnp.float32),
        grid_spec=pltpu.PrefetchScalarGridSpec(
            num_scalar_prefetch=0,
            grid=grid,
            in_specs=[
                pl.BlockSpec((tj, LD_in), lambda i, j: (j, 0)),      # X neighbor tile
                pl.BlockSpec((ti, tj), lambda i, j: (i, j)),         # edge indicator
                pl.BlockSpec((LD_in, LD_out), lambda i, j: (0, 0)),  # kron(I_L, W.T)
                pl.BlockSpec((1, LD_out), lambda i, j: (0, 0)),      # tile(b, L)
            ],
            out_specs=pl.BlockSpec((ti, LD_out), lambda i, j: (i, 0)),
            scratch_shapes=[pltpu.VMEM((ti, LD_in), jnp.float32),    # feature acc
                            pltpu.VMEM((ti, 1), jnp.float32)],       # degree acc
        ),
        compiler_params=pltpu.CompilerParams(
            dimension_semantics=("parallel", "arbitrary"),
            vmem_limit_bytes=48 * 1024 * 1024,
        ),
        cost_estimate=cost,
    )(x_flat, mask, w_block, b_full)

    # TODO(synk): for genuinely sparse, very large graphs replace the dense
    # (N, N) indicator matmul with a CSR gather-accumulate (scalar-prefetched
    # row offsets / column indices + manual DMA of neighbor rows); the dense
    # path is O(N^2) in HBM traffic and MXU work.
    return out2[:N].reshape(N, L, Dout)


# ---------------------------------------------------------------------------
# Pure-numpy reference that follows the PyTorch edge loop literally
# (including the attention math that cancels) — used only to validate.
# ---------------------------------------------------------------------------
def reference_forward(X, A, params, num_heads, out_feats):
    X = np.asarray(X, np.float32)
    A = np.asarray(A, np.float32)
    N, L, Din = X.shape
    W = np.asarray(params["W_weight"])
    b = np.asarray(params["W_bias"])
    attn = np.asarray(params["attn"])                     # (1, H, 2F)
    we_w = np.asarray(params["w_embed_weight"])           # (H, 1)
    we_b = np.asarray(params["w_embed_bias"])             # (H,)

    Xp = (X.reshape(N * L, Din) @ W.T + b).reshape(N, L, num_heads, out_feats)
    Xp = Xp.transpose(0, 2, 1, 3)                         # (N, H, L, F)
    h_pooled = Xp.mean(axis=2)                            # (N, H, F)

    msgs = np.zeros((N, num_heads, L, out_feats), np.float32)
    rows, cols = np.nonzero(A)
    for i, j in zip(rows, cols):
        w_ij = A[i, j]
        attn_input = np.concatenate([h_pooled[i], h_pooled[j]], axis=-1)  # (H, 2F)
        e = (attn_input[None] * attn).sum(-1)                             # (1, H)
        e = np.where(e > 0, e, 0.01 * e)                                  # leaky_relu
        w_emb = np.array([[w_ij]], np.float32) @ we_w.T + we_b            # (1, H)
        e = e + w_emb[0]
        z = np.exp(e - e.max(axis=0, keepdims=True))
        alpha = z / z.sum(axis=0, keepdims=True)          # softmax over size-1 dim -> 1
        msgs[i] += alpha.reshape(-1, 1, 1) * Xp[j]
    return msgs.transpose(0, 2, 1, 3).reshape(N, L, -1)


# ---------------------------------------------------------------------------
if __name__ == "__main__":
    N, L = 8, 8
    in_feats, out_feats, num_heads = 32, 16, 2
    Dout = out_feats * num_heads

    key = jax.random.PRNGKey(0)
    k1, k2, k3, k4, k5, k6, k7, k8 = jax.random.split(key, 8)

    params = {
        # nn.Linear(in_feats, out_feats * num_heads)
        "W_weight": 0.1 * jax.random.normal(k1, (Dout, in_feats), jnp.float32),
        "W_bias": 0.1 * jax.random.normal(k2, (Dout,), jnp.float32),
        # attention parameters exist in the module but cancel out of the output
        "attn": jax.random.normal(k3, (1, num_heads, out_feats * 2), jnp.float32),
        "w_embed_weight": jax.random.normal(k4, (num_heads, 1), jnp.float32),
        "w_embed_bias": jax.random.normal(k5, (num_heads,), jnp.float32),
    }

    # Inputs
    X = jax.random.normal(k6, (N, L, in_feats), jnp.float32)
    edge_mask = (jax.random.uniform(k7, (N, N)) < 0.4).astype(jnp.float32)
    edge_w = jax.random.uniform(k8, (N, N), jnp.float32, 0.1, 1.0)
    A_dense = edge_mask * edge_w                          # dense stand-in for CSR

    out = seq_gat_batch_forward(X, A_dense, params)
    out = jax.block_until_ready(out)

    ref = reference_forward(X, A_dense, params, num_heads, out_feats)
    assert out.shape == (N, L, Dout)
    # bf16 MXU operands for the aggregation (f32 accumulation / projection) ->
    # looser tolerance than pure f32.
    np.testing.assert_allclose(np.asarray(out), ref, rtol=5e-2, atol=5e-2)

    print("KERNEL_OK")
</pallas_src>

<mosaic_0001>
module attributes {stable_mosaic.version = 11 : i64} {
  func.func @_gat_agg_project_kernel(%arg0: i32, %arg1: i32, %arg2: memref<16x256xbf16, #tpu.memory_space<vmem>>, %arg3: memref<16x16xbf16, #tpu.memory_space<vmem>>, %arg4: memref<256x256xf32, #tpu.memory_space<vmem>>, %arg5: memref<1x256xf32, #tpu.memory_space<vmem>>, %arg6: memref<16x256xf32, #tpu.memory_space<vmem>>, %arg7: memref<16x256xf32, #tpu.memory_space<vmem>>, %arg8: memref<16x1xf32, #tpu.memory_space<vmem>>) attributes {dimension_semantics = [#tpu.dimension_semantics<parallel>, #tpu.dimension_semantics<arbitrary>], iteration_bounds = array<i64: 1, 1>, scalar_prefetch = 0 : i64, scratch_operands = 2 : i64, tpu.core_type = #tpu.core_type<tc>, window_params = [{transform_indices = @transform_0, window_bounds = array<i64: 16, 256>}, {transform_indices = @transform_1, window_bounds = array<i64: 16, 16>}, {pipeline_mode = #tpu.pipeline_mode<synchronous>, transform_indices = @transform_2, window_bounds = array<i64: 256, 256>}, {pipeline_mode = #tpu.pipeline_mode<synchronous>, transform_indices = @transform_3, window_bounds = array<i64: 1, 256>}, {transform_indices = @transform_4, window_bounds = array<i64: 16, 256>}]} {
    %c0_i32 = arith.constant 0 : i32
    %0 = arith.cmpi eq, %arg1, %c0_i32 : i32
    %1 = arith.extui %0 : i1 to i32
    %c0_i32_0 = arith.constant 0 : i32
    %2 = arith.cmpi ne, %1, %c0_i32_0 : i32
    scf.if %2 {
      %cst_15 = arith.constant 0.000000e+00 : f32
      %18 = vector.broadcast %cst_15 : f32 to vector<16x256xf32>
      %c0_16 = arith.constant 0 : index
      %c0_17 = arith.constant 0 : index
      %19 = vector.load %arg7[%c0_16, %c0_17] : memref<16x256xf32, #tpu.memory_space<vmem>>, vector<16x256xf32>
      tpu.vector_store %arg7[%c0_16, %c0_17], %18 {strides = array<i32>} : memref<16x256xf32, #tpu.memory_space<vmem>>, vector<16x256xf32>,
      %cst_18 = arith.constant 0.000000e+00 : f32
      %20 = vector.broadcast %cst_18 : f32 to vector<16x1xf32>
      %c0_19 = arith.constant 0 : index
      %c0_20 = arith.constant 0 : index
      %21 = vector.load %arg8[%c0_19, %c0_20] : memref<16x1xf32, #tpu.memory_space<vmem>>, vector<16x1xf32>
      tpu.vector_store %arg8[%c0_19, %c0_20], %20 {strides = array<i32>} : memref<16x1xf32, #tpu.memory_space<vmem>>, vector<16x1xf32>,
    } else {
    }
    %c0 = arith.constant 0 : index
    %c0_1 = arith.constant 0 : index
    %3 = vector.load %arg3[%c0, %c0_1] : memref<16x16xbf16, #tpu.memory_space<vmem>>, vector<16x16xbf16>
    %c0_2 = arith.constant 0 : index
    %c0_3 = arith.constant 0 : index
    %4 = vector.load %arg7[%c0_2, %c0_3] : memref<16x256xf32, #tpu.memory_space<vmem>>, vector<16x256xf32>
    %c0_4 = arith.constant 0 : index
    %c0_5 = arith.constant 0 : index
    %5 = vector.load %arg2[%c0_4, %c0_5] : memref<16x256xbf16, #tpu.memory_space<vmem>>, vector<16x256xbf16>
    %cst = arith.constant dense<0.000000e+00> : vector<16x256xf32>
    %6 = tpu.matmul %3, %5, %cst {dimension_numbers = #tpu.dot_dimension_numbers<[1], [0], [0], [1], [0, 0, 1, 1], [], []>} : vector<16x16xbf16>, vector<16x256xbf16>, vector<16x256xf32> -> vector<16x256xf32>
    %7 = arith.addf %4, %6 : vector<16x256xf32>
    %c0_6 = arith.constant 0 : index
    %c0_7 = arith.constant 0 : index
    %8 = vector.load %arg7[%c0_6, %c0_7] : memref<16x256xf32, #tpu.memory_space<vmem>>, vector<16x256xf32>
    tpu.vector_store %arg7[%c0_6, %c0_7], %7 {strides = array<i32>} : memref<16x256xf32, #tpu.memory_space<vmem>>, vector<16x256xf32>,
    %c0_8 = arith.constant 0 : index
    %c0_9 = arith.constant 0 : index
    %9 = vector.load %arg8[%c0_8, %c0_9] : memref<16x1xf32, #tpu.memory_space<vmem>>, vector<16x1xf32>
    %10 = arith.extf %3 : vector<16x16xbf16> to vector<16x16xf32>
    %cst_10 = arith.constant dense<0.000000e+00> : vector<16xf32>
    %11 = vector.multi_reduction <add>, %10, %cst_10 [1] : vector<16x16xf32> to vector<16xf32>
    %12 = vector.shape_cast %11 : vector<16xf32> to vector<16x1xf32>
    %13 = arith.addf %9, %12 : vector<16x1xf32>
    %c0_11 = arith.constant 0 : index
    %c0_12 = arith.constant 0 : index
    %14 = vector.load %arg8[%c0_11, %c0_12] : memref<16x1xf32, #tpu.memory_space<vmem>>, vector<16x1xf32>
    tpu.vector_store %arg8[%c0_11, %c0_12], %13 {strides = array<i32>} : memref<16x1xf32, #tpu.memory_space<vmem>>, vector<16x1xf32>,
    %c0_i32_13 = arith.constant 0 : i32
    %15 = arith.cmpi eq, %arg1, %c0_i32_13 : i32
    %16 = arith.extui %15 : i1 to i32
    %c0_i32_14 = arith.constant 0 : i32
    %17 = arith.cmpi ne, %16, %c0_i32_14 : i32
    scf.if %17 {
      %c0_15 = arith.constant 0 : index
      %c0_16 = arith.constant 0 : index
      %18 = vector.load %arg7[%c0_15, %c0_16] : memref<16x256xf32, #tpu.memory_space<vmem>>, vector<16x256xf32>
      %c0_17 = arith.constant 0 : index
      %c0_18 = arith.constant 0 : index
      %19 = vector.load %arg4[%c0_17, %c0_18] : memref<256x256xf32, #tpu.memory_space<vmem>>, vector<256x256xf32>
      %cst_19 = arith.constant dense<0.000000e+00> : vector<16x256xf32>
      %20 = tpu.matmul %18, %19, %cst_19 {dimension_numbers = #tpu.dot_dimension_numbers<[1], [0], [0], [1], [0, 0, 1, 1], [], []>} : vector<16x256xf32>, vector<256x256xf32>, vector<16x256xf32> -> vector<16x256xf32>
      %c0_20 = arith.constant 0 : index
      %c0_21 = arith.constant 0 : index
      %21 = vector.load %arg8[%c0_20, %c0_21] : memref<16x1xf32, #tpu.memory_space<vmem>>, vector<16x1xf32>
      %c0_22 = arith.constant 0 : index
      %c0_23 = arith.constant 0 : index
      %22 = vector.load %arg5[%c0_22, %c0_23] : memref<1x256xf32, #tpu.memory_space<vmem>>, vector<1x256xf32>
      %23 = vector.broadcast %21 : vector<16x1xf32> to vector<16x256xf32>
      %24 = vector.broadcast %22 : vector<1x256xf32> to vector<16x256xf32>
      %25 = arith.mulf %23, %24 : vector<16x256xf32>
      %26 = arith.addf %20, %25 : vector<16x256xf32>
      %c0_24 = arith.constant 0 : index
      %c0_25 = arith.constant 0 : index
      %27 = vector.load %arg6[%c0_24, %c0_25] : memref<16x256xf32, #tpu.memory_space<vmem>>, vector<16x256xf32>
      tpu.vector_store %arg6[%c0_24, %c0_25], %26 {strides = array<i32>} : memref<16x256xf32, #tpu.memory_space<vmem>>, vector<16x256xf32>,
    } else {
    }
    return
  }
  func.func @transform_0(%arg0: i32, %arg1: i32) -> (i32, i32) {
    %c0_i32 = arith.constant 0 : i32
    %c0_i32_0 = arith.constant 0 : i32
    return %arg1, %c0_i32 : i32, i32
  }
  func.func @transform_1(%arg0: i32, %arg1: i32) -> (i32, i32) {
    %c0_i32 = arith.constant 0 : i32
    return %arg0, %arg1 : i32, i32
  }
  func.func @transform_2(%arg0: i32, %arg1: i32) -> (i32, i32) {
    %c0_i32 = arith.constant 0 : i32
    %c0_i32_0 = arith.constant 0 : i32
    %c0_i32_1 = arith.constant 0 : i32
    return %c0_i32, %c0_i32_0 : i32, i32
  }
  func.func @transform_3(%arg0: i32, %arg1: i32) -> (i32, i32) {
    %c0_i32 = arith.constant 0 : i32
    %c0_i32_0 = arith.constant 0 : i32
    %c0_i32_1 = arith.constant 0 : i32
    return %c0_i32, %c0_i32_0 : i32, i32
  }
  func.func @transform_4(%arg0: i32, %arg1: i32) -> (i32, i32) {
    %c0_i32 = arith.constant 0 : i32
    %c0_i32_0 = arith.constant 0 : i32
    return %arg0, %c0_i32 : i32, i32
  }
}

</mosaic_0001>

<bundles_post_ra>
// kernel: tpu_custom_call.1
= control target key start
LH: loop header
LB: loop body
LE: loop exit
PB: predicated region body
PF: predicated region fallthrough
CT: control target
= control target key end

     0   :  { %9 = vsyncpa [#allocation5], 0  ;;  %s563_s0 = inlined_call_operand.hbm [shape: bf16[16,256], index: 0, kind: input, shape index: {}]   ;;  %s564_s1 = inlined_call_operand.hbm [shape: bf16[16,16], index: 1, kind: input, shape index: {}]   ;;  %s565_s2 = inlined_call_operand.hbm [shape: f32[256,256], index: 2, kind: input, shape index: {}]   ;;  %s566_s3 = inlined_call_operand.vmem [shape: f32[1,256], index: 3, kind: input, shape index: {}]   ;;  %s567_s4 = inlined_call_operand.hbm [shape: f32[16,256], index: 4, kind: output, shape index: {}]  }
   0x1   :  { %10 = vsyncpa [#allocation8], 0  ;;  %s29_s17 = sshll.u32 %s564_s1, 4  ;;  %s30_s17 = int_to_ptr.hbm [resolvable:$true] %s29_s17 }
   0x2   :  { %11 = vsyncpa [#allocation6], 0  ;;  %s497_s18 = smov [#allocation7]   ;;  %s16_s22 = sshll.u32 %s563_s0, 4  ;;  %s17_s22 = int_to_ptr.hbm [resolvable:$true] %s16_s22 }
   0x3   :  { %s31_s19 = sshll.u32 %s497_s18, 4  ;;  %s498_s23 = smov 64   ;;  %s32_s19 = int_to_ptr.vmem [resolvable:$true] %s31_s19 }
   0x4   :  { %s499_s24 = smov 4   ;;  %s500_s25 = smov [#allocation4]  }
   0x5   :  { %37 = dma.hbm_to_vmem [thread:$0]  %s30_s17, 128, %s32_s19, [#allocation8], %s498_s23, %s498_s23, %s499_s24  }
   0x6   :  { %s18_s26 = sshll.u32 %s500_s25, 4  ;;  %s501_s27 = smov 128   ;;  %s19_s26 = int_to_ptr.vmem [resolvable:$true] %s18_s26 }
   0x7   :  { %s502_s28 = smov 8   ;;  %s42_s30 = sshll.u32 %s565_s2, 4  ;;  %s43_s30 = int_to_ptr.hbm [resolvable:$true] %s42_s30 }
   0x8   :  { %24 = dma.hbm_to_vmem [thread:$0]  %s17_s22, 256, %s19_s26, [#allocation5], %s501_s27, %s501_s27, %s502_s28  }
   0x9   :  { %s503_s5 = smov [#allocation9]   ;;  %s504_s7 = smov 256  }
   0xa   :  { %s44_s6 = sshll.u32 %s503_s5, 4  ;;  %s505_s0 = smov 16   ;;  %s45_s6 = int_to_ptr.vmem [resolvable:$true] %s44_s6 }
   0xb   :  { %50 = dma.hbm_to_vmem [thread:$0]  %s43_s30, 8192, %s45_s6, [#allocation8], %s504_s7, %s504_s7, %s505_s0  }
   0xc   :  { %491 = dma.done.wait [#allocation5], 256  }
   0xd   :  { %492 = vsyncadd [#allocation5], 4294967040 }
   0xe   :  { %493 = dma.done.wait [#allocation8], 8320  }
   0xf   :  { %494 = vsyncadd [#allocation8], 4294958976  ;;  %v370_v0 = vld [vmem:[#allocation4] sm:$0xf]  ;;  %v380_v1 = vld [vmem:[#allocation4 + $0x4] sm:$0xf0] }
  0x10   :  { %v379_v2 = vld [vmem:[#allocation4 + $0x4] sm:$0xf]  ;;  %v371_v3 = vor.u32 %v380_v1, %v370_v0  ;;  %v372_v4 = vld [vmem:[#allocation4 + $0x8] sm:$0xf0]  ;;  %v378_v5 = vld [vmem:[#allocation7] sm:$0xff]  ;;  %vm74_vm0 = vcmask 7168  }
  0x11   :  { %v77_v6 = vld [vmem:[#allocation7] sm:$0xff]   ;;  %v375_v7 = vor.u32 %v379_v2, %v372_v4  ;;  %v192_v9 = vld [vmem:[#allocation9 + $0xf0] sm:$0xff]  ;;  %v506_v12 = vmov 0.0   ;;  %vm100_vm1 = vcmask 130048   ;;  %v190_v15 = vld [vmem:[#allocation9 + $0xe0] sm:$0xff]  ;;  %s350_s12 = sshll.u32 %s567_s4, 4  ;;  %s351_s12 = int_to_ptr.hbm [resolvable:$true] %s350_s12 }
  0x12   :  { %v142_v8 = vunpack.c.l.bf16 %v77_v6  ;;  %v224_v10 = vld [vmem:[#allocation9 + $0x1f0] sm:$0xff]  ;;  %v193_v11 = vld [vmem:[#allocation9 + $0xf8] sm:$0xff]  ;;  %75 = vst.msk [vmem:[#allocation3] sm:$0xff] %vm74_vm0, %v506_v12  ;;  %111 = vmatpush.bf16.msra.mxu0 %v371_v3  ;;  %248 = vmatpush.msra.mxu2 %v192_v9  ;;  %v222_v16 = vld [vmem:[#allocation9 + $0x1e0] sm:$0xff]  ;;  %v143_v18 = vunpack.c.h.bf16 %v77_v6 }
  0x13   :  { %v225_v13 = vld [vmem:[#allocation9 + $0x1f8] sm:$0xff]  ;;  %76 = vst.msk [vmem:[#allocation3 + $0x8] sm:$0xff] %vm74_vm0, %v506_v12  ;;  %125 = vmatpush.bf16.msra.mxu1 %v375_v7  ;;  %271 = vmatpush.msra.mxu3 %v224_v10  ;;  %v191_v17 = vld [vmem:[#allocation9 + $0xe8] sm:$0xff]  ;;  %v188_v20 = vld [vmem:[#allocation9 + $0xd0] sm:$0xff] }
  0x14   :  { %v144_v14 = vsel %vm100_vm1, %v142_v8, 0.0  ;;  %v223_v19 = vld [vmem:[#allocation9 + $0x1e8] sm:$0xff]  ;;  %249 = vmatpush.msra.mxu2 %v190_v15  ;;  %v220_v21 = vld [vmem:[#allocation9 + $0x1d0] sm:$0xff]  ;;  %v189_v22 = vld [vmem:[#allocation9 + $0xd8] sm:$0xff]  ;;  %v147_v27 = vsel %vm100_vm1, %v143_v18, 0.0 }
  0x15   :  { %145 = vadd.xlane.f32.xlu0 %v144_v14  ;;  %376 = vmatmul.msk.bf16.vlgmr.msra.gmra.mxu0 %vm100_vm1, %v378_v5  ;;  %v221_v23 = vld [vmem:[#allocation9 + $0x1d8] sm:$0xff]  ;;  %v186_v24 = vld [vmem:[#allocation9 + $0xc0] sm:$0xff]  ;;  %v187_v26 = vld [vmem:[#allocation9 + $0xc8] sm:$0xff] }
  0x16   :  { %294 = vmatpush.msrb.mxu0 %v193_v11  ;;  %377 = vmatmul.msk.bf16.vlgmr.msra.gmra.mxu1 %vm100_vm1, %v378_v5  ;;  %v218_v25 = vld [vmem:[#allocation9 + $0x1c0] sm:$0xff]  ;;  %v219_v28 = vld [vmem:[#allocation9 + $0x1c8] sm:$0xff]  ;;  %v184_v29 = vld [vmem:[#allocation9 + $0xb0] sm:$0xff] }
  0x17   :  { %317 = vmatpush.msrb.mxu1 %v225_v13  ;;  %272 = vmatpush.msra.mxu3 %v222_v16  ;;  %v216_v30 = vld [vmem:[#allocation9 + $0x1b0] sm:$0xff]  ;;  %v185_v31 = vld [vmem:[#allocation9 + $0xb8] sm:$0xff]  ;;  %v182_v33 = vld [vmem:[#allocation9 + $0xa0] sm:$0xff]  ;;  %v507_v13 = vmov 0  }
  0x18   :  { %295 = vmatpush.msrb.mxu0 %v191_v17  ;;  %250 = vmatpush.msra.mxu2 %v188_v20  ;;  %v217_v32 = vld [vmem:[#allocation9 + $0x1b8] sm:$0xff]  ;;  %v214_v34 = vld [vmem:[#allocation9 + $0x1a0] sm:$0xff]  ;;  %v183_v35 = vld [vmem:[#allocation9 + $0xa8] sm:$0xff] }
  0x19   :  { %318 = vmatpush.msrb.mxu1 %v223_v19  ;;  %273 = vmatpush.msra.mxu3 %v220_v21  ;;  %v215_v36 = vld [vmem:[#allocation9 + $0x1a8] sm:$0xff]  ;;  %v180_v37 = vld [vmem:[#allocation9 + $0x90] sm:$0xff]  ;;  %v181_v39 = vld [vmem:[#allocation9 + $0x98] sm:$0xff] }
  0x1a   :  { %296 = vmatpush.msrb.mxu0 %v189_v22  ;;  %251 = vmatpush.msra.mxu2 %v186_v24  ;;  %v212_v38 = vld [vmem:[#allocation9 + $0x190] sm:$0xff]  ;;  %v213_v40 = vld [vmem:[#allocation9 + $0x198] sm:$0xff]  ;;  %v178_v41 = vld [vmem:[#allocation9 + $0x80] sm:$0xff] }
  0x1b   :  { %319 = vmatpush.msrb.mxu1 %v221_v23  ;;  %274 = vmatpush.msra.mxu3 %v218_v25  ;;  %v210_v42 = vld [vmem:[#allocation9 + $0x180] sm:$0xff]  ;;  %v179_v43 = vld [vmem:[#allocation9 + $0x88] sm:$0xff]  ;;  %v176_v45 = vld [vmem:[#allocation9 + $0x70] sm:$0xff] }
  0x1c   :  { %297 = vmatpush.msrb.mxu0 %v187_v26  ;;  %252 = vmatpush.msra.mxu2 %v184_v29  ;;  %v211_v44 = vld [vmem:[#allocation9 + $0x188] sm:$0xff]  ;;  %v208_v46 = vld [vmem:[#allocation9 + $0x170] sm:$0xff]  ;;  %v177_v47 = vld [vmem:[#allocation9 + $0x78] sm:$0xff] }
  0x1d   :  { %148 = vadd.xlane.f32.xlu0 %v147_v27  ;;  %320 = vmatpush.msrb.mxu1 %v219_v28  ;;  %v209_v48 = vld [vmem:[#allocation9 + $0x178] sm:$0xff]  ;;  %v174_v49 = vld [vmem:[#allocation9 + $0x60] sm:$0xff]  ;;  %v175_v51 = vld [vmem:[#allocation9 + $0x68] sm:$0xff] }
  0x1e   :  { %275 = vmatpush.msra.mxu3 %v216_v30  ;;  %298 = vmatpush.msrb.mxu0 %v185_v31  ;;  %v206_v50 = vld [vmem:[#allocation9 + $0x160] sm:$0xff]  ;;  %v207_v52 = vld [vmem:[#allocation9 + $0x168] sm:$0xff]  ;;  %v172_v53 = vld [vmem:[#allocation9 + $0x50] sm:$0xff] }
  0x1f   :  { %321 = vmatpush.msrb.mxu1 %v217_v32  ;;  %253 = vmatpush.msra.mxu2 %v182_v33  ;;  %v204_v54 = vld [vmem:[#allocation9 + $0x150] sm:$0xff]  ;;  %v173_v55 = vld [vmem:[#allocation9 + $0x58] sm:$0xff]  ;;  %v170_v57 = vld [vmem:[#allocation9 + $0x40] sm:$0xff] }
  0x20   :  { %276 = vmatpush.msra.mxu3 %v214_v34  ;;  %299 = vmatpush.msrb.mxu0 %v183_v35  ;;  %v205_v56 = vld [vmem:[#allocation9 + $0x158] sm:$0xff]  ;;  %v202_v58 = vld [vmem:[#allocation9 + $0x140] sm:$0xff]  ;;  %v171_v59 = vld [vmem:[#allocation9 + $0x48] sm:$0xff] }
  0x21   :  { %322 = vmatpush.msrb.mxu1 %v215_v36  ;;  %254 = vmatpush.msra.mxu2 %v180_v37  ;;  %v203_v60 = vld [vmem:[#allocation9 + $0x148] sm:$0xff]  ;;  %v168_v61 = vld [vmem:[#allocation9 + $0x30] sm:$0xff]  ;;  %v169_v63 = vld [vmem:[#allocation9 + $0x38] sm:$0xff] }
  0x22   :  { %277 = vmatpush.msra.mxu3 %v212_v38  ;;  %300 = vmatpush.msrb.mxu0 %v181_v39  ;;  %v200_v62 = vld [vmem:[#allocation9 + $0x130] sm:$0xff]  ;;  %v201_v0 = vld [vmem:[#allocation9 + $0x138] sm:$0xff]  ;;  %v166_v1 = vld [vmem:[#allocation9 + $0x20] sm:$0xff] }
  0x23   :  { %323 = vmatpush.msrb.mxu1 %v213_v40  ;;  %255 = vmatpush.msra.mxu2 %v178_v41  ;;  %v198_v2 = vld [vmem:[#allocation9 + $0x120] sm:$0xff]  ;;  %v167_v3 = vld [vmem:[#allocation9 + $0x28] sm:$0xff]  ;;  %v164_v5 = vld [vmem:[#allocation9 + $0x10] sm:$0xff] }
  0x24   :  { %278 = vmatpush.msra.mxu3 %v210_v42  ;;  %301 = vmatpush.msrb.mxu0 %v179_v43  ;;  %v199_v4 = vld [vmem:[#allocation9 + $0x128] sm:$0xff]  ;;  %v196_v6 = vld [vmem:[#allocation9 + $0x110] sm:$0xff]  ;;  %v165_v7 = vld [vmem:[#allocation9 + $0x18] sm:$0xff] }
  0x25   :  { %324 = vmatpush.msrb.mxu1 %v211_v44  ;;  %256 = vmatpush.msra.mxu2 %v176_v45  ;;  %v197_v8 = vld [vmem:[#allocation9 + $0x118] sm:$0xff]  ;;  %v162_v9 = vld [vmem:[#allocation9] sm:$0xff]  ;;  %v163_v11 = vld [vmem:[#allocation9 + $0x8] sm:$0xff] }
  0x26   :  { %279 = vmatpush.msra.mxu3 %v208_v46  ;;  %302 = vmatpush.msrb.mxu0 %v177_v47  ;;  %v194_v10 = vld [vmem:[#allocation9 + $0x100] sm:$0xff]  ;;  %v195_v12 = vld [vmem:[#allocation9 + $0x108] sm:$0xff]  ;;  %v140_v14 = vld [vmem:[#allocation3] sm:$0xff] }
  0x27   :  { %325 = vmatpush.msrb.mxu1 %v209_v48  ;;  %257 = vmatpush.msra.mxu2 %v174_v49  ;;  %v141_v17 = vld [vmem:[#allocation3 + $0x8] sm:$0xff]  ;;  %v228_v26 = vld [vmem:[%s566_s3] sm:$0x3]  ;;  %s508_s3 = smov [#allocation10]  }
  0x28   :  { %280 = vmatpush.msra.mxu3 %v206_v50  ;;  %303 = vmatpush.msrb.mxu0 %v175_v51  ;;  %v241_v27 = vperm.slane %v228_v26, 1  ;;  %v240_v30 = vperm.slane %v228_v26, 0  ;;  %s348_s9 = sshll.u32 %s508_s3, 4  ;;  %s349_s9 = int_to_ptr.vmem [resolvable:$true] %s348_s9 }
  0x29   :  { %326 = vmatpush.msrb.mxu1 %v207_v52  ;;  %258 = vmatpush.msra.mxu2 %v172_v53 }
  0x2a   :  { %281 = vmatpush.msra.mxu3 %v204_v54  ;;  %304 = vmatpush.msrb.mxu0 %v173_v55 }
  0x2b   :  { %327 = vmatpush.msrb.mxu1 %v205_v56  ;;  %259 = vmatpush.msra.mxu2 %v170_v57 }
  0x2c   :  { %282 = vmatpush.msra.mxu3 %v202_v58  ;;  %305 = vmatpush.msrb.mxu0 %v171_v59 }
  0x2d   :  { %328 = vmatpush.msrb.mxu1 %v203_v60  ;;  %260 = vmatpush.msra.mxu2 %v168_v61 }
  0x2e   :  { %283 = vmatpush.msra.mxu3 %v200_v62  ;;  %306 = vmatpush.msrb.mxu0 %v169_v63 }
  0x2f   :  { %329 = vmatpush.msrb.mxu1 %v201_v0  ;;  %261 = vmatpush.msra.mxu2 %v166_v1 }
  0x30   :  { %284 = vmatpush.msra.mxu3 %v198_v2  ;;  %307 = vmatpush.msrb.mxu0 %v167_v3 }
  0x31   :  { %330 = vmatpush.msrb.mxu1 %v199_v4  ;;  %262 = vmatpush.msra.mxu2 %v164_v5 }
  0x32   :  { %285 = vmatpush.msra.mxu3 %v196_v6  ;;  %308 = vmatpush.msrb.mxu0 %v165_v7 }
  0x33   :  { %331 = vmatpush.msrb.mxu1 %v197_v8  ;;  %263 = vmatpush.msra.mxu2 %v162_v9 }
  0x34   :  { %286 = vmatpush.msra.mxu3 %v194_v10  ;;  %309 = vmatpush.msrb.mxu0 %v163_v11 }
  0x35   :  { %332 = vmatpush.msrb.mxu1 %v195_v12  ;;  %393 = vset.pattern.permute.xlu1 %v507_v13 }
  0x36   :  { %394 = vset.pattern.permute.xlu0 %v507_v13 }
  0x88   :  { %v146_v15 = vpop.xlane.xlu0 %145 }
  0x89   :  { %v150_v16 = vadd.f32 %v146_v15, %v140_v14 }
  0x8b   :  { %153 = vst.msk [vmem:[#allocation3] sm:$0xff] %vm74_vm0, %v150_v16 }
  0x90   :  { %v149_v18 = vpop.xlane.xlu0 %148 }
  0x91   :  { %v151_v19 = vadd.f32 %v149_v18, %v141_v17 }
  0x92   :  { %v226_v20 = vld [vmem:[#allocation3] sm:$0xff]  ;;  %v113_v21 = vpop.f32.mrf.mxu0 }
  0x93   :  { %154 = vst.msk [vmem:[#allocation3 + $0x8] sm:$0xff] %vm74_vm0, %v151_v19  ;;  %231 = vperm.xlu1 %393, %v226_v20   ;;  %v127_v22 = vpop.f32.mrf.mxu1  ;;  %264 = vmatmul.f32.vlgmr.msra.gmra.mxu2 %v113_v21 }
  0x94   :  { %310 = vmatmul.f32.vlgmr.msrb.gmra.mxu0 %v113_v21  ;;  %287 = vmatmul.f32.vlgmr.msra.gmra.mxu3 %v127_v22 }
  0x95   :  { %333 = vmatmul.f32.vlgmr.msrb.gmra.mxu1 %v127_v22 }
  0x9a   :  { %v227_v23 = vld [vmem:[#allocation3 + $0x8] sm:$0xff]  ;;  %v115_v24 = vpop.f32.mrf.mxu0 }
  0x9b   :  { %236 = vperm.xlu1 %393, %v227_v23   ;;  %v129_v25 = vpop.f32.mrf.mxu1  ;;  %267 = vmatmul.f32.gmra.mxu2 %v115_v24 }
  0x9c   :  { %313 = vmatmul.f32.gmra.mxu0 %v115_v24  ;;  %290 = vmatmul.f32.gmra.mxu3 %v129_v25 }
  0x9d   :  { %336 = vmatmul.f32.gmra.mxu1 %v129_v25 }
 0x105   :  { %v232_v28 = vpop.permute.xlu1 %231 }
 0x106   :  { %v245_v29 = vmul.f32 %v241_v27, %v232_v28  ;;  %v244_v34 = vmul.f32 %v240_v30, %v232_v28 }
 0x10d   :  { %v237_v36 = vpop.permute.xlu1 %236 }
 0x10e   :  { %v247_v38 = vmul.f32 %v241_v27, %v237_v36  ;;  %v246_v46 = vmul.f32 %v240_v30, %v237_v36 }
 0x111   :  { %v311_v31 = vpop.f32.mrf.mxu0 }
 0x112   :  { %v312_v32 = vadd.f32 %v311_v31, %v245_v29  ;;  %v334_v33 = vpop.f32.mrf.mxu1 }
 0x114   :  { %v335_v35 = vadd.f32 %v334_v33, %v312_v32 }
 0x116   :  { %341 = vst [vmem:[#allocation10 + $0x8] sm:$0xff] %v335_v35  ;;  %v265_v37 = vpop.f32.mrf.mxu2 }
 0x117   :  { %v266_v39 = vadd.f32 %v265_v37, %v244_v34  ;;  %v288_v40 = vpop.f32.mrf.mxu3 }
 0x119   :  { %v314_v41 = vpop.f32.mrf.mxu0  ;;  %v289_v42 = vadd.f32 %v288_v40, %v266_v39 }
 0x11a   :  { %v315_v43 = vadd.f32 %v314_v41, %v247_v38  ;;  %v337_v44 = vpop.f32.mrf.mxu1 }
 0x11b   :  { %340 = vst [vmem:[#allocation10] sm:$0xff] %v289_v42 }
 0x11c   :  { %v338_v45 = vadd.f32 %v337_v44, %v315_v43 }
 0x11e   :  { %343 = vst [vmem:[#allocation10 + $0x18] sm:$0xff] %v338_v45  ;;  %v268_v47 = vpop.f32.mrf.mxu2 }
 0x11f   :  { %v269_v48 = vadd.f32 %v268_v47, %v246_v46  ;;  %v291_v49 = vpop.f32.mrf.mxu3 }
 0x121   :  { %v292_v50 = vadd.f32 %v291_v49, %v269_v48 }
 0x123   :  { %342 = vst [vmem:[#allocation10 + $0x10] sm:$0xff] %v292_v50 }
 0x124   :  { %356 = dma.vmem_to_hbm [thread:$0]  %s349_s9, 512, %s351_s12, [#allocation6], %s504_s7, %s504_s7, %s505_s0  }
 0x125   :  { %495 = dma.done.wait [#allocation6], 512  }
 0x126   :  { %496 = vsyncadd [#allocation6], 4294966784 }
 0x127   :  { %361 = vsyncpa [#allocation5], 1 }
 0x128   :  { %362 = vsyncpa [#allocation8], 1 }
 0x129   :  { %363 = vsyncpa [#allocation6], 1 }

</bundles_post_ra>
